<compile_context>
chip_gen: v7x
topology: tpu7x:2x2x1
jax: 0.10.0
libtpu: 0.0.40
codegen_flags: <defaults>
</compile_context>

<pallas_src>
import jax
import jax.numpy as jnp
from jax.experimental import pallas as pl
from jax.experimental.pallas import tpu as pltpu


def _no_object_add_kernel(score_ref, embed_ref, mem_ref, out_ref):
    """out = mem + (score < 0) * embed, broadcast over the lane (last) axis.

    score_ref: (TR, 1)   f32       per-row object score (row = (b, c))
    embed_ref: (TR, 1)   out dtype per-row no-object embed value
    mem_ref:   (TR, TL)  in dtype  flattened memory-encoding tile
    out_ref:   (TR, TL)  out dtype
    """
    flag = (score_ref[...] < 0.0).astype(out_ref.dtype)          # (TR, 1)
    additive = flag * embed_ref[...]                              # (TR, 1)
    out_ref[...] = mem_ref[...].astype(out_ref.dtype) + additive  # one full-tile add/vst


# ----------------------------------------------------------------------------
# Hardware queries (best-effort; conservative defaults if unavailable).
# ----------------------------------------------------------------------------
def _tpu_info():
    try:
        return pltpu.get_tpu_info()
    except Exception:
        return None


def _getattr_int(obj, names, default):
    for name in names:
        try:
            v = int(getattr(obj, name))
        except (AttributeError, TypeError, ValueError):
            continue
        if v > 0:
            return v
    return default


def _num_tensorcores(info):
    # Only force grid splitting when we positively know there are >= 2 cores.
    return _getattr_int(
        info,
        ("num_cores", "cores_per_chip", "num_tensorcores",
         "tensorcores_per_chip", "core_count"),
        1,
    )


def _vmem_capacity_bytes(info):
    # v7x has the smallest physical VMEM (64 MiB) -> safe default.
    return _getattr_int(
        info, ("vmem_capacity_bytes", "vmem_bytes", "vmem_size_bytes"), 64 << 20
    )


# ----------------------------------------------------------------------------
# Tile selection: (row_tile, lane_tile) obeying the (8, 128) block rule.
# ----------------------------------------------------------------------------
def _choose_tiles(rows, lanes, bytes_per_elem, target_bytes, num_cores):
    """row_tile divides `rows` and is a multiple of 8 (or == rows);
    lane_tile divides `lanes` and is a multiple of 128 (or == lanes)."""
    row_divs = sorted({d for d in range(8, rows + 1, 8) if rows % d == 0} | {rows})
    lane_divs = sorted({d for d in range(128, lanes + 1, 128) if lanes % d == 0} | {lanes})

    def nbytes(tr, tl):
        return tr * tl * bytes_per_elem

    # Biggest row tile that fits the target with the full lane extent.
    tl = lanes
    fitting = [d for d in row_divs if nbytes(d, tl) <= target_bytes]
    if fitting:
        tr = fitting[-1]
    else:
        # Even the smallest legal row tile over full lanes is too big ->
        # tile the lane axis as well (large-slab / VMEM-budget fallback).
        tr = row_divs[0]
        lane_fit = [d for d in lane_divs if nbytes(tr, d) <= target_bytes]
        tl = lane_fit[-1] if lane_fit else lane_divs[0]

    # Dual-TensorCore parts only: prefer an even number of grid steps (>= 2)
    # so both cores get balanced work.  Single-core chips keep one big step.
    if num_cores >= 2:
        steps = (rows // tr) * (lanes // tl)
        if steps < 2 or steps % 2:
            smaller_rows = [d for d in row_divs if d < tr and (rows // d) % 2 == 0]
            smaller_lanes = [d for d in lane_divs if d < tl and (lanes // d) % 2 == 0]
            if smaller_rows:
                tr = smaller_rows[-1]
            elif smaller_lanes:
                tl = smaller_lanes[-1]
    return tr, tl


# ----------------------------------------------------------------------------
# Public wrapper.
# ----------------------------------------------------------------------------
def no_object_encoder_v2p1(memory_encoding, object_score, no_object_embed,
                           *, donate_memory_encoding=False):
    """
    Args:
      memory_encoding: (B, C, H, W)
      object_score:    (B, 1)
      no_object_embed: (1, C)  (learned parameter)
      donate_memory_encoding: alias the input buffer to the output when the
        caller donates it (only applied when dtypes match).
    Returns:
      (B, C, H, W) in jnp.result_type(memory_encoding, no_object_embed),
      matching PyTorch's promotion of `memory + additive`.
    """
    B, C, H, W = memory_encoding.shape
    assert object_score.shape == (B, 1)
    assert no_object_embed.shape == (1, C)

    R, HW = B * C, H * W
    in_dtype = memory_encoding.dtype
    out_dtype = jnp.result_type(in_dtype, no_object_embed.dtype)
    in_item = jnp.dtype(in_dtype).itemsize
    out_item = jnp.dtype(out_dtype).itemsize

    info = _tpu_info()
    num_cores = _num_tensorcores(info)
    vmem_cap = _vmem_capacity_bytes(info)

    # VMEM ceiling: ~40 MiB on a 64 MiB-VMEM chip (v7x), capped at 48 MiB on
    # 128 MiB chips (v5e/v6e).  Tile target keeps 2x(in+out) + headroom under it.
    vmem_hi = max(16 << 20, min((vmem_cap * 5) // 8, 48 << 20))
    target = min(12 << 20, max(1 << 20, (vmem_hi - (4 << 20)) // 2))

    tr, tl = _choose_tiles(R, HW, in_item + out_item, target, num_cores)
    grid = (R // tr, HW // tl)

    # Double-buffered in/out tiles + the two tiny lane-padded (tr, 1) columns
    # + headroom.  Stays <= vmem_hi by construction of `target` above.
    tile_bytes = tr * tl * (in_item + out_item)
    col_bytes = tr * 128 * (4 + out_item)
    vmem_limit = int(min(max(2 * tile_bytes + 2 * col_bytes + (2 << 20), 16 << 20),
                         vmem_hi))

    # Free/contiguous layout plumbing; the compare/multiply/add stay in-kernel.
    mem2 = memory_encoding.reshape(R, HW)
    score_rows = jnp.repeat(object_score.reshape(B), C).reshape(R, 1).astype(jnp.float32)
    embed_rows = jnp.tile(no_object_embed.reshape(1, C), (B, 1)).reshape(R, 1).astype(out_dtype)

    aliases = {}
    if donate_memory_encoding and in_dtype == out_dtype:
        aliases = {2: 0}  # alias mem2 -> output (caller must donate the buffer)

    out2 = pl.pallas_call(
        _no_object_add_kernel,
        out_shape=jax.ShapeDtypeStruct((R, HW), out_dtype),
        grid=grid,
        in_specs=[
            pl.BlockSpec((tr, 1), lambda r, h: (r, 0)),    # per-row score
            pl.BlockSpec((tr, 1), lambda r, h: (r, 0)),    # per-row embed value
            pl.BlockSpec((tr, tl), lambda r, h: (r, h)),   # memory tile
        ],
        out_specs=pl.BlockSpec((tr, tl), lambda r, h: (r, h)),
        compiler_params=pltpu.CompilerParams(
            dimension_semantics=("parallel", "parallel"),
            vmem_limit_bytes=vmem_limit,
        ),
        input_output_aliases=aliases,
    )(score_rows, embed_rows, mem2)

    return out2.reshape(B, C, H, W)


# ----------------------------------------------------------------------------
# Pure-JAX reference and self-test.
# ----------------------------------------------------------------------------
def _reference(memory_encoding, object_score, no_object_embed):
    mask = (object_score < 0.0).astype(no_object_embed.dtype)        # (B, 1)
    additive = (mask * no_object_embed)[:, :, None, None]            # (B, C, 1, 1)
    return memory_encoding + additive


if __name__ == "__main__":
    key = jax.random.PRNGKey(0)
    k_mem, k_embed, k_mem2, k_embed2 = jax.random.split(key, 4)

    # Case 1: nominal small shape (features_per_memory_token = C = 4).
    B, C, H, W = 2, 4, 16, 16
    memory_encoding = jax.random.normal(k_mem, (B, C, H, W), dtype=jnp.float32)
    object_score = jnp.array([[-1.5], [2.0]], dtype=jnp.float32)  # both branches
    no_object_embed = jax.random.normal(k_embed, (1, C), dtype=jnp.float32)

    out = no_object_encoder_v2p1(memory_encoding, object_score, no_object_embed)
    out = jax.block_until_ready(out)
    ref = _reference(memory_encoding, object_score, no_object_embed)
    assert out.shape == memory_encoding.shape and out.dtype == ref.dtype
    assert jnp.allclose(out, ref, atol=1e-6, rtol=1e-6), "case 1 mismatch vs reference"

    # Case 2: B=1 inference-style shape with mixed precision (bf16 memory,
    # f32 embed) -> output promotes to f32 exactly like the PyTorch reference.
    B2, C2, H2, W2 = 1, 64, 8, 8
    mem_b = jax.random.normal(k_mem2, (B2, C2, H2, W2), dtype=jnp.bfloat16)
    score_b = jnp.array([[-0.25]], dtype=jnp.float32)
    embed_b = jax.random.normal(k_embed2, (1, C2), dtype=jnp.float32)

    out_b = jax.block_until_ready(no_object_encoder_v2p1(mem_b, score_b, embed_b))
    ref_b = _reference(mem_b, score_b, embed_b)
    assert out_b.shape == mem_b.shape and out_b.dtype == ref_b.dtype == jnp.float32
    assert jnp.allclose(out_b, ref_b, atol=1e-6, rtol=1e-6), "case 2 mismatch vs reference"

    print("KERNEL_OK")
</pallas_src>

<mosaic_0001>
module attributes {stable_mosaic.version = 11 : i64} {
  func.func @_no_object_add_kernel(%arg0: i32, %arg1: i32, %arg2: memref<8x1xf32, #tpu.memory_space<vmem>>, %arg3: memref<8x1xf32, #tpu.memory_space<vmem>>, %arg4: memref<8x256xf32, #tpu.memory_space<vmem>>, %arg5: memref<8x256xf32, #tpu.memory_space<vmem>>) attributes {dimension_semantics = [#tpu.dimension_semantics<parallel>, #tpu.dimension_semantics<parallel>], iteration_bounds = array<i64: 1, 1>, scalar_prefetch = 0 : i64, scratch_operands = 0 : i64, tpu.core_type = #tpu.core_type<tc>, window_params = [{transform_indices = @transform_0, window_bounds = array<i64: 8, 1>}, {transform_indices = @transform_1, window_bounds = array<i64: 8, 1>}, {transform_indices = @transform_2, window_bounds = array<i64: 8, 256>}, {transform_indices = @transform_3, window_bounds = array<i64: 8, 256>}]} {
    %c0 = arith.constant 0 : index
    %c0_0 = arith.constant 0 : index
    %0 = vector.load %arg2[%c0, %c0_0] : memref<8x1xf32, #tpu.memory_space<vmem>>, vector<8x1xf32>
    %cst = arith.constant 0.000000e+00 : f32
    %1 = vector.broadcast %cst : f32 to vector<8x1xf32>
    %2 = arith.cmpf olt, %0, %1 : vector<8x1xf32>
    %3 = arith.extui %2 : vector<8x1xi1> to vector<8x1xi32>
    %4 = arith.sitofp %3 : vector<8x1xi32> to vector<8x1xf32>
    %c0_1 = arith.constant 0 : index
    %c0_2 = arith.constant 0 : index
    %5 = vector.load %arg3[%c0_1, %c0_2] : memref<8x1xf32, #tpu.memory_space<vmem>>, vector<8x1xf32>
    %6 = arith.mulf %4, %5 : vector<8x1xf32>
    %c0_3 = arith.constant 0 : index
    %c0_4 = arith.constant 0 : index
    %7 = vector.load %arg4[%c0_3, %c0_4] : memref<8x256xf32, #tpu.memory_space<vmem>>, vector<8x256xf32>
    %8 = vector.broadcast %6 : vector<8x1xf32> to vector<8x256xf32>
    %9 = arith.addf %7, %8 : vector<8x256xf32>
    %c0_5 = arith.constant 0 : index
    %c0_6 = arith.constant 0 : index
    %10 = vector.load %arg5[%c0_5, %c0_6] : memref<8x256xf32, #tpu.memory_space<vmem>>, vector<8x256xf32>
    tpu.vector_store %arg5[%c0_5, %c0_6], %9 {strides = array<i32>} : memref<8x256xf32, #tpu.memory_space<vmem>>, vector<8x256xf32>,
    return
  }
  func.func @transform_0(%arg0: i32, %arg1: i32) -> (i32, i32) {
    %c0_i32 = arith.constant 0 : i32
    %c0_i32_0 = arith.constant 0 : i32
    return %arg0, %c0_i32 : i32, i32
  }
  func.func @transform_1(%arg0: i32, %arg1: i32) -> (i32, i32) {
    %c0_i32 = arith.constant 0 : i32
    %c0_i32_0 = arith.constant 0 : i32
    return %arg0, %c0_i32 : i32, i32
  }
  func.func @transform_2(%arg0: i32, %arg1: i32) -> (i32, i32) {
    %c0_i32 = arith.constant 0 : i32
    return %arg0, %arg1 : i32, i32
  }
  func.func @transform_3(%arg0: i32, %arg1: i32) -> (i32, i32) {
    %c0_i32 = arith.constant 0 : i32
    return %arg0, %arg1 : i32, i32
  }
}

</mosaic_0001>

<bundles_post_ra>
// kernel: tpu_custom_call.1
= control target key start
LH: loop header
LB: loop body
LE: loop exit
PB: predicated region body
PF: predicated region fallthrough
CT: control target
= control target key end

     0   :  { %v75_v2 = vmov 0   ;;  %s122_s0 = inlined_call_operand.vmem [shape: f32[8,1], index: 0, kind: input, shape index: {}]   ;;  %s123_s1 = inlined_call_operand.vmem [shape: f32[8,1], index: 1, kind: input, shape index: {}]   ;;  %s124_s2 = inlined_call_operand.vmem [shape: f32[8,256], index: 2, kind: input, shape index: {}]   ;;  %s125_s3 = inlined_call_operand.hbm [shape: f32[8,256], index: 3, kind: output, shape index: {}]  }
   0x1   :  { %v15_v0 = vld [vmem:[%s122_s0] sm:$0xff]  ;;  %50 = vset.pattern.permute.xlu0 %v75_v2 }
   0x2   :  { %v19_v1 = vld [vmem:[%s123_s1] sm:$0xff]  ;;  %vm16_vm0 = vcmp.lt.f32.partialorder %v15_v0, 0.0 }
   0x3   :  { %8 = vsyncpa [#allocation3], 0  ;;  %v76_v3 = vmov 0.0   ;;  %v21_v6 = vld [vmem:[%s124_s2] sm:$0xff]  ;;  %v22_v7 = vld [vmem:[%s124_s2 + $0x8] sm:$0xff]  ;;  %s77_s0 = smov [#allocation2]  }
   0x4   :  { %v46_v4 = vsel %vm16_vm0, 1.0, %v76_v3  ;;  %s38_s20 = sshll.u32 %s77_s0, 4  ;;  %s39_s20 = int_to_ptr.vmem [resolvable:$true] %s38_s20 }
   0x5   :  { %v20_v5 = vmul.f32 %v46_v4, %v19_v1  ;;  %s51_s1 = scalar_lea.vmem %s39_s20, 256  ;;  %p56_p1 = scmp.lt.s32.totalorder %s39_s20, %s39_s20 }
   0x6   :  { %p52_p0 = scmp.ne.s32.totalorder %s39_s20, %s51_s1  ;;  %p57_p2 = scmp.lt.s32.totalorder %s51_s1, %s51_s1 }
   0x7   :  { %25 = vperm.xlu0 %50, %v20_v5  }
   0x8   :  { %p58_p3 = por %p57_p2, %p56_p1 }
   0xa   :  { %p59_p4 = pnand %p58_p3, %p52_p0 }
  0x86   :  { %v26_v8 = vpop.permute.xlu0 %25 }
  0x87   :  { %v28_v9 = vadd.f32 %v26_v8, %v21_v6  ;;  %v29_v10 = vadd.f32 %v26_v8, %v22_v7 }
  0x89   :  { %30 = vst [vmem:[#allocation2] sm:$0xff] %v28_v9  ;;  %31 = vst [vmem:[#allocation2 + $0x8] sm:$0xff] %v29_v10 }
  0x8a   :  { %62 = shalt.err (!%p59_p4)
}
  0x8b   :  { %s63_s23 = scalar_lea.hbm %s125_s3, 256 }
  0x8c   :  { %p64_p5 = scmp.ne.s32.totalorder %s125_s3, %s63_s23  ;;  %p67_p6 = scmp.lt.u32.totalorder %s63_s23, %s125_s3 }
  0x8e   :  { %p69_p7 = pnand %p67_p6, %p64_p5 }
  0x90   :  { %72 = shalt.err (!%p69_p7)
}
  0x91   :  { %41 = dma.vmem_to_hbm [thread:$0]  %s39_s20, 256, %s125_s3, [#allocation3]  }
  0x92   :  { %73 = dma.done.wait [#allocation3], 256  }
  0x93   :  { %74 = vsyncadd [#allocation3], 4294967040 }
  0x94   :  { %45 = vsyncpa [#allocation3], 1 }

</bundles_post_ra>
